<compile_context>
chip_gen: v7x
topology: tpu7x:2x2x1
jax: 0.10.0
libtpu: 0.0.40
codegen_flags: <defaults>
</compile_context>

<pallas_src>
import jax
import jax.numpy as jnp
from jax import lax
from jax.experimental import pallas as pl
from jax.experimental.pallas import tpu as pltpu

LN_EPS = 1e-5  # torch.nn.LayerNorm default


def _round_up(x, m):
    return (x + m - 1) // m * m


def _vmem_budget_and_limit():
    """Generation-aware VMEM sizing (v5e/v6e: 128 MiB phys, v7x: 64 MiB)."""
    try:
        cap = int(pltpu.get_tpu_info().vmem_capacity_bytes)
    except Exception:
        cap = 64 * 1024 * 1024  # conservative fallback (v7x physical size)
    limit = min(cap // 2, 64 * 1024 * 1024)   # v5e/v6e -> 64 MiB, v7x -> 32 MiB
    budget = (limit * 3) // 4                 # headroom for compiler scratch
    return budget, limit


def elbcn_kernel(l1b_ref, x_ref, wf_ref, p_ref, out_ref, ln_ref):
    # l1b_ref: (1,)        SMEM  (l1 bias scalar)
    # x_ref:   (TB, G*D)   VMEM  (flattened batch rows)
    # wf_ref:  (G*D, D)    VMEM  (folded group-mixing weights)
    # p_ref:   (3, D)      VMEM  (gamma / beta / l1 weight)
    # out_ref: (TB, 1)     VMEM   ln_ref: (TB, D) VMEM
    x = x_ref[...]                                           # (TB, G*D) f32

    # Group contraction on the MXU.  HIGHEST precision -> f32-accurate result
    # (weights like 1/6 are not bf16-exact, and the LN that follows is
    # sensitive to the mean/variance of y).
    y = jnp.dot(x, wf_ref[...],
                preferred_element_type=jnp.float32,
                precision=lax.Precision.HIGHEST)             # (TB, D)

    # LayerNorm over last dim (biased variance, as in torch.nn.LayerNorm).
    mean = jnp.mean(y, axis=-1, keepdims=True)
    centered = y - mean
    var = jnp.mean(centered * centered, axis=-1, keepdims=True)
    inv = lax.rsqrt(var + LN_EPS)

    p = p_ref[...]                                           # (3, D)
    ln = centered * inv * p[0:1, :] + p[1:2, :]              # (TB, D)

    # Linear(D -> 1): elementwise mul + lane reduce (D=32, VPU/XLU).
    v = jnp.sum(ln * p[2:3, :], axis=-1, keepdims=True) + l1b_ref[0]  # (TB, 1)

    out_ref[...] = 0.5 * (jnp.tanh(v) + 1.0)
    ln_ref[...] = ln.astype(ln_ref.dtype)


def elbcn_forward(x, weight, gamma, beta, l1_w, l1_b, *, block_b=None):
    """x: (B, G, D) float32. Returns (out (B,), layernorm (B, D))."""
    B, G, D = x.shape
    GD = G * D

    budget, vmem_limit = _vmem_budget_and_limit()

    # Double-buffered VMEM bytes per batch row (lane dims pad to 128):
    #   x block + ln block + out block.
    bytes_per_row = 4 * 2 * (_round_up(GD, 128) + _round_up(D, 128) + 128)
    # Fixed (grid-invariant) buffers: w_fold and the fused (3, D) params tile.
    fixed_bytes = 4 * 2 * (_round_up(GD, 8) * _round_up(D, 128)
                           + 8 * _round_up(D, 128))

    if block_b is None:
        block_b = max(8, min(8192,
                             ((budget - fixed_bytes) // bytes_per_row) // 8 * 8))
    block_b = _round_up(int(block_b), 8)        # keep (8,128) rule on outputs
    block_b = min(block_b, _round_up(B, 8))

    # Pad batch so it divides evenly into blocks (padded rows produce finite
    # garbage that is sliced off; rows are independent so no cross-talk).
    Bp = _round_up(B, block_b)
    x2d = x.reshape(B, GD)                      # contiguous -> free reshape
    if Bp != B:
        x2d = jnp.pad(x2d, ((0, Bp - B), (0, 0)))
    grid = (Bp // block_b,)

    # Fold the G-contraction into an MXU matmul: w_fold[g*D + d, d] = weight[g].
    w_fold = (weight.reshape(G, 1, 1)
              * jnp.eye(D, dtype=jnp.float32)).reshape(GD, D)
    # gamma / beta / l1 weight share one VMEM tile.
    p3 = jnp.concatenate([gamma.reshape(1, D),
                          beta.reshape(1, D),
                          l1_w.reshape(1, D)], axis=0)        # (3, D)

    smem_spec = pl.BlockSpec(memory_space=pltpu.MemorySpace.SMEM)

    out, ln = pl.pallas_call(
        elbcn_kernel,
        out_shape=(
            jax.ShapeDtypeStruct((Bp, 1), jnp.float32),
            jax.ShapeDtypeStruct((Bp, D), jnp.float32),
        ),
        grid=grid,
        in_specs=[
            smem_spec,                                        # l1_b (1,)
            pl.BlockSpec((block_b, GD), lambda i: (i, 0)),    # x (flattened)
            pl.BlockSpec((GD, D), lambda i: (0, 0)),          # w_fold
            pl.BlockSpec((3, D), lambda i: (0, 0)),           # gamma/beta/l1_w
        ],
        out_specs=(
            pl.BlockSpec((block_b, 1), lambda i: (i, 0)),     # out
            pl.BlockSpec((block_b, D), lambda i: (i, 0)),     # ln
        ),
        compiler_params=pltpu.CompilerParams(
            # TODO(synk): on v7x, pltpu.CORE_PARALLEL here would guarantee both
            # TensorCores split the batch; "parallel" kept for portability.
            dimension_semantics=("parallel",),
            vmem_limit_bytes=vmem_limit,
        ),
    )(l1_b.reshape(-1), x2d, w_fold, p3)

    return out[:B].reshape(-1), ln[:B]


def init_params(key, dense_size, output_number):
    G = output_number - 2
    D = dense_size
    # self.weight = full(1/(output_number - 2))
    weight = jnp.full((1, G), 1.0 / G, dtype=jnp.float32)
    # LayerNorm affine params (default init)
    gamma = jnp.ones((1, D), dtype=jnp.float32)
    beta = jnp.zeros((1, D), dtype=jnp.float32)
    # l1: Linear(D, 1), xavier_uniform_ weight, zero bias
    bound = (6.0 / (D + 1)) ** 0.5
    l1_w = jax.random.uniform(key, (1, D), jnp.float32, -bound, bound)
    l1_b = jnp.zeros((1,), dtype=jnp.float32)
    return weight, gamma, beta, l1_w, l1_b


def reference_forward(x, weight, gamma, beta, l1_w, l1_b):
    y = jnp.einsum('og,bgd->bd', weight, x, precision=lax.Precision.HIGHEST)
    mean = jnp.mean(y, axis=-1, keepdims=True)
    var = jnp.mean((y - mean) ** 2, axis=-1, keepdims=True)
    ln = (y - mean) / jnp.sqrt(var + LN_EPS) * gamma + beta
    v = jnp.sum(ln * l1_w, axis=-1) + l1_b[0]
    return 0.5 * (jnp.tanh(v) + 1.0), ln


if __name__ == "__main__":
    dense_size = 32
    output_number = 8          # G = output_number - 2 = 6
    B = 16
    G, D = output_number - 2, dense_size

    key = jax.random.PRNGKey(0)
    kx, kp = jax.random.split(key)
    x = jax.random.normal(kx, (B, G, D), dtype=jnp.float32)
    params = init_params(kp, dense_size, output_number)

    # Auto tile choice (single grid step at this tiny B).
    out, ln = elbcn_forward(x, *params)
    # Forced small tile: exercises multi-step batch grid + DMA pipelining.
    out2, ln2 = elbcn_forward(x, *params, block_b=8)
    jax.block_until_ready((out, ln, out2, ln2))

    ref_out, ref_ln = reference_forward(x, *params)
    assert out.shape == (B,) and ln.shape == (B, D)
    for o, l in ((out, ln), (out2, ln2)):
        assert jnp.allclose(o, ref_out, atol=2e-5, rtol=2e-5)
        assert jnp.allclose(l, ref_ln, atol=2e-5, rtol=2e-5)

    print("KERNEL_OK")
</pallas_src>

<mosaic_0001>
module attributes {stable_mosaic.version = 11 : i64} {
  func.func @elbcn_kernel(%arg0: i32, %arg1: memref<1xf32, #tpu.memory_space<smem>>, %arg2: memref<16x192xf32, #tpu.memory_space<vmem>>, %arg3: memref<192x32xf32, #tpu.memory_space<vmem>>, %arg4: memref<3x32xf32, #tpu.memory_space<vmem>>, %arg5: memref<16x1xf32, #tpu.memory_space<vmem>>, %arg6: memref<16x32xf32, #tpu.memory_space<vmem>>) attributes {dimension_semantics = [#tpu.dimension_semantics<parallel>], iteration_bounds = array<i64: 1>, scalar_prefetch = 0 : i64, scratch_operands = 0 : i64, tpu.core_type = #tpu.core_type<tc>, window_params = [{transform_indices = @transform_0, window_bounds = array<i64: 1>}, {transform_indices = @transform_1, window_bounds = array<i64: 16, 192>}, {pipeline_mode = #tpu.pipeline_mode<synchronous>, transform_indices = @transform_2, window_bounds = array<i64: 192, 32>}, {pipeline_mode = #tpu.pipeline_mode<synchronous>, transform_indices = @transform_3, window_bounds = array<i64: 3, 32>}, {transform_indices = @transform_4, window_bounds = array<i64: 16, 1>}, {transform_indices = @transform_5, window_bounds = array<i64: 16, 32>}]} {
    %c0 = arith.constant 0 : index
    %c0_0 = arith.constant 0 : index
    %0 = vector.load %arg2[%c0, %c0_0] : memref<16x192xf32, #tpu.memory_space<vmem>>, vector<16x192xf32>
    %c0_1 = arith.constant 0 : index
    %c0_2 = arith.constant 0 : index
    %1 = vector.load %arg3[%c0_1, %c0_2] : memref<192x32xf32, #tpu.memory_space<vmem>>, vector<192x32xf32>
    %cst = arith.constant dense<0.000000e+00> : vector<16x32xf32>
    %2 = tpu.matmul %0, %1, %cst {dimension_numbers = #tpu.dot_dimension_numbers<[1], [0], [0], [1], [0, 0, 1, 1], [], []>, precision = #tpu.contract_precision<fp32>} : vector<16x192xf32>, vector<192x32xf32>, vector<16x32xf32> -> vector<16x32xf32>
    %cst_3 = arith.constant dense<0.000000e+00> : vector<16xf32>
    %3 = vector.multi_reduction <add>, %2, %cst_3 [1] : vector<16x32xf32> to vector<16xf32>
    %4 = vector.shape_cast %3 : vector<16xf32> to vector<16x1xf32>
    %cst_4 = arith.constant 3.200000e+01 : f32
    %5 = vector.broadcast %cst_4 : f32 to vector<16x1xf32>
    %6 = arith.divf %4, %5 : vector<16x1xf32>
    %7 = vector.broadcast %6 : vector<16x1xf32> to vector<16x32xf32>
    %8 = arith.subf %2, %7 : vector<16x32xf32>
    %9 = arith.mulf %8, %8 : vector<16x32xf32>
    %cst_5 = arith.constant dense<0.000000e+00> : vector<16xf32>
    %10 = vector.multi_reduction <add>, %9, %cst_5 [1] : vector<16x32xf32> to vector<16xf32>
    %11 = vector.shape_cast %10 : vector<16xf32> to vector<16x1xf32>
    %cst_6 = arith.constant 3.200000e+01 : f32
    %12 = vector.broadcast %cst_6 : f32 to vector<16x1xf32>
    %13 = arith.divf %11, %12 : vector<16x1xf32>
    %cst_7 = arith.constant 9.99999974E-6 : f32
    %14 = vector.broadcast %cst_7 : f32 to vector<16x1xf32>
    %15 = arith.addf %13, %14 : vector<16x1xf32>
    %16 = math.rsqrt %15 : vector<16x1xf32>
    %c0_8 = arith.constant 0 : index
    %c0_9 = arith.constant 0 : index
    %17 = vector.load %arg4[%c0_8, %c0_9] : memref<3x32xf32, #tpu.memory_space<vmem>>, vector<3x32xf32>
    %18 = vector.broadcast %16 : vector<16x1xf32> to vector<16x32xf32>
    %19 = arith.mulf %8, %18 : vector<16x32xf32>
    %20 = vector.extract_strided_slice %17 {offsets = [0, 0], sizes = [1, 32], strides = [1, 1]} : vector<3x32xf32> to vector<1x32xf32>
    %21 = vector.broadcast %20 : vector<1x32xf32> to vector<16x32xf32>
    %22 = arith.mulf %19, %21 : vector<16x32xf32>
    %23 = vector.extract_strided_slice %17 {offsets = [1, 0], sizes = [1, 32], strides = [1, 1]} : vector<3x32xf32> to vector<1x32xf32>
    %24 = vector.broadcast %23 : vector<1x32xf32> to vector<16x32xf32>
    %25 = arith.addf %22, %24 : vector<16x32xf32>
    %26 = vector.extract_strided_slice %17 {offsets = [2, 0], sizes = [1, 32], strides = [1, 1]} : vector<3x32xf32> to vector<1x32xf32>
    %27 = vector.broadcast %26 : vector<1x32xf32> to vector<16x32xf32>
    %28 = arith.mulf %25, %27 : vector<16x32xf32>
    %cst_10 = arith.constant dense<0.000000e+00> : vector<16xf32>
    %29 = vector.multi_reduction <add>, %28, %cst_10 [1] : vector<16x32xf32> to vector<16xf32>
    %30 = vector.shape_cast %29 : vector<16xf32> to vector<16x1xf32>
    %c0_11 = arith.constant 0 : index
    %31 = memref.load %arg1[%c0_11] : memref<1xf32, #tpu.memory_space<smem>>
    %32 = vector.broadcast %31 : f32 to vector<16x1xf32>
    %33 = arith.addf %30, %32 : vector<16x1xf32>
    %34 = math.tanh %33 : vector<16x1xf32>
    %cst_12 = arith.constant 1.000000e+00 : f32
    %35 = vector.broadcast %cst_12 : f32 to vector<16x1xf32>
    %36 = arith.addf %34, %35 : vector<16x1xf32>
    %cst_13 = arith.constant 5.000000e-01 : f32
    %37 = vector.broadcast %cst_13 : f32 to vector<16x1xf32>
    %38 = arith.mulf %37, %36 : vector<16x1xf32>
    %c0_14 = arith.constant 0 : index
    %c0_15 = arith.constant 0 : index
    %39 = vector.load %arg5[%c0_14, %c0_15] : memref<16x1xf32, #tpu.memory_space<vmem>>, vector<16x1xf32>
    tpu.vector_store %arg5[%c0_14, %c0_15], %38 {strides = array<i32>} : memref<16x1xf32, #tpu.memory_space<vmem>>, vector<16x1xf32>,
    %c0_16 = arith.constant 0 : index
    %c0_17 = arith.constant 0 : index
    %40 = vector.load %arg6[%c0_16, %c0_17] : memref<16x32xf32, #tpu.memory_space<vmem>>, vector<16x32xf32>
    tpu.vector_store %arg6[%c0_16, %c0_17], %25 {strides = array<i32>} : memref<16x32xf32, #tpu.memory_space<vmem>>, vector<16x32xf32>,
    return
  }
  func.func @transform_0(%arg0: i32) -> i32 {
    %c0_i32 = arith.constant 0 : i32
    %c0_i32_0 = arith.constant 0 : i32
    return %c0_i32 : i32
  }
  func.func @transform_1(%arg0: i32) -> (i32, i32) {
    %c0_i32 = arith.constant 0 : i32
    %c0_i32_0 = arith.constant 0 : i32
    return %arg0, %c0_i32 : i32, i32
  }
  func.func @transform_2(%arg0: i32) -> (i32, i32) {
    %c0_i32 = arith.constant 0 : i32
    %c0_i32_0 = arith.constant 0 : i32
    %c0_i32_1 = arith.constant 0 : i32
    return %c0_i32, %c0_i32_0 : i32, i32
  }
  func.func @transform_3(%arg0: i32) -> (i32, i32) {
    %c0_i32 = arith.constant 0 : i32
    %c0_i32_0 = arith.constant 0 : i32
    %c0_i32_1 = arith.constant 0 : i32
    return %c0_i32, %c0_i32_0 : i32, i32
  }
  func.func @transform_4(%arg0: i32) -> (i32, i32) {
    %c0_i32 = arith.constant 0 : i32
    %c0_i32_0 = arith.constant 0 : i32
    return %arg0, %c0_i32 : i32, i32
  }
  func.func @transform_5(%arg0: i32) -> (i32, i32) {
    %c0_i32 = arith.constant 0 : i32
    %c0_i32_0 = arith.constant 0 : i32
    return %arg0, %c0_i32 : i32, i32
  }
}

</mosaic_0001>

<bundles_post_ra>
// kernel: tpu_custom_call.1
= control target key start
LH: loop header
LB: loop body
LE: loop exit
PB: predicated region body
PF: predicated region fallthrough
CT: control target
= control target key end

     0   :  { %v1894_v3 = vmov 0.0|0.0   ;;  %s1868_s0 = inlined_call_operand.<no memory space> [shape: f32[1], index: 0, kind: input, shape index: {}]   ;;  %s1869_s1 = inlined_call_operand.vmem [shape: f32[16,192], index: 1, kind: input, shape index: {}]   ;;  %s1870_s2 = inlined_call_operand.vmem [shape: f32[192,32], index: 2, kind: input, shape index: {}]   ;;  %s1871_s3 = inlined_call_operand.vmem [shape: f32[3,32], index: 3, kind: input, shape index: {}]   ;;  %s1872_s4 = inlined_call_operand.vmem [shape: f32[16,1], index: 4, kind: output, shape index: {0}]   ;;  %s1873_s5 = inlined_call_operand.hbm [shape: f32[16,32], index: 5, kind: output, shape index: {1}]  }
   0x1   :  { %v1265_v0 = vld [vmem:[%s1870_s2] sm:$0xff]  ;;  %v1270_v1 = vld [vmem:[%s1870_s2 + $0x8] sm:$0xff]  ;;  %v1275_v2 = vld [vmem:[%s1870_s2 + $0x10] sm:$0xff]  ;;  %958 = vmatprep.subr.bf16.mxu1 %v1894_v3  ;;  %1066 = vmatprep.subr.bf16.mxu0 %v1894_v3 }
   0x2   :  { %v57_v4 = vand.u32 4294901760, %v1265_v0  ;;  %v60_v5 = vand.u32 4294901760, %v1270_v1  ;;  %v1284_v6 = vld [vmem:[%s1870_s2 + $0x18] sm:$0xff]  ;;  %v63_v7 = vand.u32 4294901760, %v1275_v2  ;;  %v1291_v9 = vld [vmem:[%s1870_s2 + $0x20] sm:$0xff]  ;;  %v1296_v10 = vld [vmem:[%s1870_s2 + $0x28] sm:$0xff] }
   0x3   :  { %v66_v8 = vand.u32 4294901760, %v1284_v6  ;;  %v69_v13 = vand.u32 4294901760, %v1291_v9  ;;  %v72_v14 = vand.u32 4294901760, %v1296_v10  ;;  %v1319_v15 = vld [vmem:[%s1870_s2 + $0x30] sm:$0xff]  ;;  %v1324_v16 = vld [vmem:[%s1870_s2 + $0x38] sm:$0xff] }
   0x4   :  { %v1302_v11 = vpack.c.bf16 %v60_v5, %v57_v4  ;;  %v75_v18 = vand.u32 4294901760, %v1319_v15  ;;  %v78_v19 = vand.u32 4294901760, %v1324_v16 }
   0x5   :  { %v1310_v12 = vpack.c.bf16 %v66_v8, %v63_v7  ;;  %v1332_v17 = vpack.c.bf16 %v72_v14, %v69_v13 }
   0x6   :  { %960 = vmatpush1.bf16.msra.mxu1 %v1302_v11  ;;  %1068 = vmatpush1.bf16.msra.mxu0 %v1302_v11 }
   0x7   :  { %961 = vmatprep.subr.bf16.mxu1 %v1894_v3  ;;  %1069 = vmatprep.subr.bf16.mxu0 %v1894_v3 }
   0xa   :  { %963 = vmatpush1.bf16.msra.mxu1 %v1310_v12  ;;  %1071 = vmatpush1.bf16.msra.mxu0 %v1310_v12 }
   0xb   :  { %12 = vsyncpa [#allocation4], 0  ;;  %964 = vmatprep.subr.bf16.mxu1 %v1894_v3  ;;  %1072 = vmatprep.subr.bf16.mxu0 %v1894_v3  ;;  %v1341_v20 = vld [vmem:[%s1870_s2 + $0x40] sm:$0xff]  ;;  %v1346_v21 = vld [vmem:[%s1870_s2 + $0x48] sm:$0xff]  ;;  %vm49_vm0 = vcmask 523264   ;;  %v1357_v23 = vpack.c.bf16 %v78_v19, %v75_v18  ;;  %v1483_v60 = vsub.f32 %v1265_v0, %v57_v4  ;;  %v1488_v61 = vsub.f32 %v1270_v1, %v60_v5 }
   0xc   :  { %v22_v22 = vld [vmem:[%s1869_s1 + $0x8] sm:$0xff]  ;;  %v81_v24 = vand.u32 4294901760, %v1341_v20  ;;  %v1886_v25 = vand.u32 4294901760, %v1346_v21  ;;  %v1366_v26 = vld [vmem:[%s1870_s2 + $0x50] sm:$0xff]  ;;  %v1371_v27 = vld [vmem:[%s1870_s2 + $0x58] sm:$0xff]  ;;  %v1513_v1 = vsub.f32 %v1275_v2, %v63_v7  ;;  %v1520_v5 = vsub.f32 %v1284_v6, %v66_v8 }
   0xd   :  { %v51_v28 = vsel %vm49_vm0, %v22_v22, 0  ;;  %v1885_v30 = vand.u32 4294901760, %v1366_v26  ;;  %v1884_v31 = vand.u32 4294901760, %v1371_v27  ;;  %v1391_v33 = vld [vmem:[%s1870_s2 + $0x60] sm:$0xff]  ;;  %v1396_v34 = vld [vmem:[%s1870_s2 + $0x68] sm:$0xff]  ;;  %v1417_v40 = vld [vmem:[%s1870_s2 + $0x70] sm:$0xff] }
   0xe   :  { %966 = vmatpush1.bf16.msra.mxu1 %v1332_v17  ;;  %1074 = vmatpush1.bf16.msra.mxu0 %v1332_v17  ;;  %v1380_v29 = vpack.c.bf16 %v1886_v25, %v81_v24  ;;  %v1384_v32 = vand.u32 4294901760, %v51_v28  ;;  %v1883_v37 = vand.u32 4294901760, %v1391_v33  ;;  %v1882_v38 = vand.u32 4294901760, %v1396_v34  ;;  %v1422_v41 = vld [vmem:[%s1870_s2 + $0x78] sm:$0xff]  ;;  %v1440_v47 = vld [vmem:[%s1870_s2 + $0x80] sm:$0xff]  ;;  %v1445_v48 = vld [vmem:[%s1870_s2 + $0x88] sm:$0xff] }
   0xf   :  { %967 = vmatprep.subr.bf16.mxu1 %v1894_v3  ;;  %1075 = vmatprep.subr.bf16.mxu0 %v1894_v3  ;;  %v1407_v36 = vpack.c.bf16 %v1884_v31, %v1885_v30  ;;  %v1879_v44 = vand.u32 4294901760, %v1417_v40  ;;  %v1878_v45 = vand.u32 4294901760, %v1422_v41  ;;  %v1450_v49 = vld [vmem:[%s1870_s2 + $0x90] sm:$0xff]  ;;  %v1877_v51 = vand.u32 4294901760, %v1440_v47  ;;  %v1465_v53 = vld [vmem:[%s1870_s2 + $0x98] sm:$0xff]  ;;  %v21_v55 = vld [vmem:[%s1869_s1] sm:$0xff] }
  0x10   :  { %1902 = vst [vmem:[#allocation6_spill] sm:$0xff] %v1380_v29  ;;  %v1399_v35 = vsub.f32 %v51_v28, %v1384_v32  ;;  %v1431_v43 = vpack.c.bf16 %v1882_v38, %v1883_v37  ;;  %v1876_v52 = vand.u32 4294901760, %v1445_v48  ;;  %v24_v54 = vld [vmem:[%s1869_s1 + $0x18] sm:$0xff]  ;;  %v1875_v56 = vand.u32 4294901760, %v1450_v49  ;;  %v1503_v63 = vld [vmem:[%s1870_s2 + $0xa0] sm:$0xff]  ;;  %v1508_v0 = vld [vmem:[%s1870_s2 + $0xa8] sm:$0xff] }
  0x11   :  { %1903 = vst [vmem:[#allocation7_spill] sm:$0xff] %v1407_v36  ;;  %v1458_v50 = vpack.c.bf16 %v1878_v45, %v1879_v44  ;;  %v1874_v57 = vand.u32 4294901760, %v1465_v53  ;;  %v54_v58 = vsel %vm49_vm0, %v24_v54, 0  ;;  %v1478_v59 = vand.u32 4294901760, %v21_v55  ;;  %v1538_v6 = vld [vmem:[%s1870_s2 + $0xb0] sm:$0xff]  ;;  %v1543_v8 = vld [vmem:[%s1870_s2 + $0xb8] sm:$0xff] }
  0x12   :  { %969 = vmatpush1.bf16.msra.mxu1 %v1357_v23  ;;  %1077 = vmatpush1.bf16.msra.mxu0 %v1357_v23  ;;  %v146_v39 = vand.u32 4294901760, %v1399_v35  ;;  %1904 = vst [vmem:[#allocation8_spill] sm:$0xff] %v1431_v43  ;;  %v1496_v62 = vpack.c.bf16 %v1876_v52, %v1877_v51  ;;  %v1515_v4 = vand.u32 4294901760, %v54_v58  ;;  %v1881_v2 = vand.u32 4294901760, %v1503_v63 }
  0x13   :  { %970 = vmatprep.subr.bf16.mxu1 %v1894_v3  ;;  %1078 = vmatprep.subr.bf16.mxu0 %v1894_v3  ;;  %1905 = vst [vmem:[#allocation9_spill] sm:$0xff] %v1458_v50  ;;  %v1526_v22 = vpack.c.bf16 %v1874_v57, %v1875_v56  ;;  %v1529_v28 = vsub.f32 %v21_v55, %v1478_v59  ;;  %v1880_v7 = vand.u32 4294901760, %v1508_v0  ;;  %v192_v57 = vand.u32 4294901760, %v1513_v1 }
  0x14   :  { %v147_v42 = vsub.f32 %v1399_v35, %v146_v39  ;;  %596 = vmatprep.mubr.f32.mxu0 %v146_v39  ;;  %1906 = vst [vmem:[#allocation10_spill] sm:$0xff] %v1496_v62  ;;  %v178_v39 = vand.u32 4294901760, %v1483_v60  ;;  %v1555_v54 = vsub.f32 %v1291_v9, %v69_v13  ;;  %v1560_v55 = vsub.f32 %v1296_v10, %v72_v14 }
  0x15   :  { %1907 = vst [vmem:[#allocation11_spill] sm:$0xff] %v1526_v22  ;;  %1908 = vst [vmem:[#allocation12_spill] sm:$0xff] %v1529_v28  ;;  %v1564_v56 = vsub.f32 %v54_v58, %v1515_v4  ;;  %v1888_v52 = vand.u32 4294901760, %v1538_v6  ;;  %v1887_v51 = vand.u32 4294901760, %v1543_v8  ;;  %v152_v45 = vand.u32 4294901760, %v1529_v28 }
  0x16   :  { %972 = vmatpush1.bf16.msra.mxu1 %v1380_v29  ;;  %1080 = vmatpush1.bf16.msra.mxu0 %v1380_v29  ;;  %v148_v46 = vand.u32 4294901760, %v147_v42  ;;  %v185_v42 = vand.u32 4294901760, %v1488_v61  ;;  %v199_v44 = vand.u32 4294901760, %v1520_v5  ;;  %v1576_v9 = vpack.c.bf16 %v1880_v7, %v1881_v2 }
  0x17   :  { %973 = vmatprep.subr.bf16.mxu1 %v1894_v3  ;;  %1081 = vmatprep.subr.bf16.mxu0 %v1894_v3  ;;  %1909 = vst [vmem:[#allocation13_spill] sm:$0xff] %v1564_v56  ;;  %v179_v10 = vsub.f32 %v1483_v60, %v178_v39  ;;  %v1585_v58 = vsub.f32 %v1319_v15, %v75_v18  ;;  %v161_v38 = vand.u32 4294901760, %v1564_v56  ;;  %vm870_vm1 = vcmask 261120  }
  0x18   :  { %149 = vmatprep.mubr.f32.mxu1 %v148_v46  ;;  %v23_v46 = vld [vmem:[%s1869_s1 + $0x10] sm:$0xff]  ;;  %1910 = vst [vmem:[#allocation14_spill] sm:$0xff] %v1576_v9  ;;  %v186_v13 = vsub.f32 %v1488_v61, %v185_v42  ;;  %v1592_v7 = vsub.f32 %v1324_v16, %v78_v19  ;;  %v193_v2 = vsub.f32 %v1513_v1, %v192_v57  ;;  %v206_v16 = vand.u32 4294901760, %v1555_v54 }
  0x19   :  { %v1580_v14 = vand.u32 4294901760, %v23_v46  ;;  %v1603_v15 = vpack.c.bf16 %v1887_v51, %v1888_v52  ;;  %v153_v18 = vsub.f32 %v1529_v28, %v152_v45  ;;  %v200_v31 = vsub.f32 %v1520_v5, %v199_v44 }
  0x1a   :  { %975 = vmatpush1.bf16.msra.mxu1 %v1407_v36  ;;  %1083 = vmatpush1.bf16.msra.mxu0 %v1407_v36  ;;  %v180_v19 = vand.u32 4294901760, %v179_v10  ;;  %v187_v30 = vand.u32 4294901760, %v186_v13  ;;  %v1615_v51 = vsub.f32 %v1341_v20, %v81_v24  ;;  %v1913_v52 = vand.u32 4294901760, %v1346_v21 }
  0x1b   :  { %976 = vmatprep.subr.bf16.mxu1 %v1894_v3  ;;  %1084 = vmatprep.subr.bf16.mxu0 %v1894_v3  ;;  %v1597_v37 = vsub.f32 %v23_v46, %v1580_v14  ;;  %1912 = vst [vmem:[#allocation16_spill] sm:$0xff] %v1603_v15  ;;  %v213_v46 = vand.u32 4294901760, %v1560_v55  ;;  %v1103_v10 = vpack.c.bf16 %v185_v42, %v178_v39  ;;  %v194_v13 = vand.u32 4294901760, %v193_v2 }
  0x1c   :  { %v1622_v28 = vsub.f32 %v1346_v21, %v1913_v52  ;;  %v995_v24 = vpack.c.bf16 %v187_v30, %v180_v19  ;;  %v220_v21 = vand.u32 4294901760, %v1585_v58  ;;  %v227_v52 = vand.u32 4294901760, %v1592_v7 }
  0x1d   :  { %1911 = vst [vmem:[#allocation15_spill] sm:$0xff] %v1597_v37  ;;  %v167_v25 = vand.u32 4294901760, %v1597_v37  ;;  %v1914_v2 = vmov 0.0|0.0   ;;  %v1916_v42 = vand.u32 4294901760, %v1371_v27  ;;  %v1106_v30 = vpack.c.bf16 %v199_v44, %v192_v57 }
  0x1e   :  { %978 = vmatpush1.bf16.msra.mxu1 %v1431_v43  ;;  %1086 = vmatpush1.bf16.msra.mxu0 %v1431_v43  ;;  %v241_v29 = vand.u32 4294901760, %v1622_v28 }
  0x1f   :  { %979 = vmatprep.subr.bf16.mxu1 %v1894_v3  ;;  %1087 = vmatprep.subr.bf16.mxu0 %v1894_v3  ;;  %v168_v20 = vsub.f32 %v1597_v37, %v167_v25 }
  0x21   :  { %v169_v43 = vand.u32 4294901760, %v168_v20 }
  0x22   :  { %981 = vmatpush1.bf16.msra.mxu1 %v1458_v50  ;;  %1089 = vmatpush1.bf16.msra.mxu0 %v1458_v50  ;;  %v207_v50 = vsub.f32 %v1555_v54, %v206_v16 }
  0x23   :  { %982 = vmatprep.subr.bf16.mxu1 %v1894_v3  ;;  %1090 = vmatprep.subr.bf16.mxu0 %v1894_v3 }
  0x26   :  { %984 = vmatpush1.bf16.msra.mxu1 %v1496_v62  ;;  %1092 = vmatpush1.bf16.msra.mxu0 %v1496_v62  ;;  %v201_v62 = vand.u32 4294901760, %v200_v31  ;;  %v1915_v31 = vand.u32 4294901760, %v1366_v26 }
  0x27   :  { %985 = vmatprep.subr.bf16.mxu1 %v1894_v3  ;;  %1093 = vmatprep.subr.bf16.mxu0 %v1894_v3 }
  0x28   :  { %v1637_v39 = vsub.f32 %v1366_v26, %v1915_v31  ;;  %v998_v37 = vpack.c.bf16 %v201_v62, %v194_v13  ;;  %v221_v26 = vsub.f32 %v1585_v58, %v220_v21  ;;  %v228_v31 = vsub.f32 %v1592_v7, %v227_v52 }
  0x29   :  { %v242_v13 = vsub.f32 %v1622_v28, %v241_v29 }
  0x2a   :  { %987 = vmatpush1.bf16.msra.mxu1 %v1526_v22  ;;  %1095 = vmatpush1.bf16.msra.mxu0 %v1526_v22  ;;  %v154_v22 = vand.u32 4294901760, %v153_v18  ;;  %v1642_v18 = vsub.f32 %v1371_v27, %v1916_v42  ;;  %v1917_v27 = vand.u32 4294901760, %v1391_v33  ;;  %v248_v62 = vand.u32 4294901760, %v1637_v39 }
  0x2b   :  { %988 = vmatprep.subr.bf16.mxu1 %v1894_v3  ;;  %1096 = vmatprep.subr.bf16.mxu0 %v1894_v3 }
  0x2c   :  { %v1653_v44 = vsub.f32 %v1391_v33, %v1917_v27 }
  0x2e   :  { %990 = vmatpush1.bf16.msra.mxu1 %v1576_v9  ;;  %1098 = vmatpush1.bf16.msra.mxu0 %v1576_v9  ;;  %v162_v9 = vsub.f32 %v1564_v56, %v161_v38  ;;  %v208_v56 = vand.u32 4294901760, %v207_v50  ;;  %v262_v20 = vand.u32 4294901760, %v1653_v44 }
  0x2f   :  { %991 = vmatprep.subr.bf16.mxu1 %v1894_v3  ;;  %1099 = vmatprep.subr.bf16.mxu0 %v1894_v3  ;;  %v214_v3 = vsub.f32 %v1560_v55, %v213_v46 }
  0x30   :  { %v163_v19 = vand.u32 4294901760, %v162_v9  ;;  %v222_v9 = vand.u32 4294901760, %v221_v26 }
  0x31   :  { %v215_v36 = vand.u32 4294901760, %v214_v3  ;;  %v1109_v3 = vpack.c.bf16 %v213_v46, %v206_v16  ;;  %v1920_v16 = vand.u32 4294901760, %v1422_v41 }
  0x32   :  { %993 = vmatpush1.bf16.msra.mxu1 %v1603_v15  ;;  %1101 = vmatpush1.bf16.msra.mxu0 %v1603_v15  ;;  %v234_v15 = vand.u32 4294901760, %v1615_v51 }
  0x33   :  { %994 = vmatprep.subr.bf16.mxu1 %v1914_v2  ;;  %1102 = vmatprep.subr.bf16.mxu0 %v1914_v2  ;;  %v1001_v33 = vpack.c.bf16 %v215_v36, %v208_v56  ;;  %v1112_v36 = vpack.c.bf16 %v227_v52, %v220_v21  ;;  %v1922_v52 = vand.u32 4294901760, %v1445_v48 }
  0x34   :  { %v235_v57 = vsub.f32 %v1615_v51, %v234_v15 }
  0x35   :  { %155 = vmatmul.mubr.f32.vlgmr.msra.gmra.mrb[0].mxu1 %v154_v22  ;;  %600 = vmatmul.mubr.f32.vlgmr.msra.gmra.mrb[0].mxu0 %v152_v45  ;;  %v1918_v45 = vand.u32 4294901760, %v1396_v34  ;;  %v255_v22 = vand.u32 4294901760, %v1642_v18  ;;  %v1692_v42 = vsub.f32 %v1445_v48, %v1922_v52  ;;  %v1923_v48 = vand.u32 4294901760, %v1450_v49 }
  0x36   :  { %996 = vmatpush1.bf16.msra.mxu1 %v995_v24  ;;  %1104 = vmatpush1.bf16.msra.mxu0 %v1103_v10  ;;  %v229_v10 = vand.u32 4294901760, %v228_v31 }
  0x37   :  { %997 = vmatprep.subr.bf16.mxu1 %v1914_v2  ;;  %1105 = vmatprep.subr.bf16.mxu0 %v1914_v2  ;;  %v1658_v50 = vsub.f32 %v1396_v34, %v1918_v45  ;;  %v1919_v34 = vand.u32 4294901760, %v1417_v40  ;;  %v256_v56 = vsub.f32 %v1642_v18, %v255_v22  ;;  %v263_v45 = vsub.f32 %v1653_v44, %v262_v20 }
  0x38   :  { %164 = vmatprep.mubr.f32.mxu1 %v163_v19  ;;  %607 = vmatprep.mubr.f32.mxu0 %v161_v38  ;;  %v1004_v46 = vpack.c.bf16 %v229_v10, %v222_v9  ;;  %v1118_v9 = vpack.c.bf16 %v255_v22, %v248_v62  ;;  %v1926_v22 = vand.u32 4294901760, %v1508_v0 }
  0x39   :  { %170 = vmatmul.mubr.f32.gmra.mrb[2].mxu1 %v169_v43  ;;  %611 = vmatmul.mubr.f32.gmra.mrb[2].mxu0 %v167_v25  ;;  %v1669_v38 = vsub.f32 %v1417_v40, %v1919_v34  ;;  %v1674_v25 = vsub.f32 %v1422_v41, %v1920_v16  ;;  %v249_v43 = vsub.f32 %v1637_v39, %v248_v62  ;;  %v243_v40 = vand.u32 4294901760, %v242_v13 }
  0x3a   :  { %999 = vmatpush1.bf16.msra.mxu1 %v998_v37  ;;  %1107 = vmatpush1.bf16.msra.mxu0 %v1106_v30  ;;  %v236_v37 = vand.u32 4294901760, %v235_v57  ;;  %v269_v24 = vand.u32 4294901760, %v1658_v50  ;;  %v1921_v41 = vand.u32 4294901760, %v1440_v47  ;;  %v1115_v30 = vpack.c.bf16 %v241_v29, %v234_v15 }
  0x3b   :  { %1000 = vmatprep.subr.bf16.mxu1 %v1914_v2  ;;  %1108 = vmatprep.subr.bf16.mxu0 %v1914_v2  ;;  %v250_v19 = vand.u32 4294901760, %v249_v43  ;;  %v257_v26 = vand.u32 4294901760, %v256_v56  ;;  %v276_v31 = vand.u32 4294901760, %v1669_v38  ;;  %v1703_v29 = vsub.f32 %v1450_v49, %v1923_v48 }
  0x3c   :  { %360 = vmatprep.mubr.f32.mxu1 %v1384_v32  ;;  %753 = vmatprep.mubr.f32.mxu0 %v1384_v32  ;;  %v1687_v21 = vsub.f32 %v1440_v47, %v1921_v41  ;;  %v1007_v27 = vpack.c.bf16 %v243_v40, %v236_v37  ;;  %v283_v47 = vand.u32 4294901760, %v1674_v25  ;;  %v1924_v15 = vand.u32 4294901760, %v1465_v53 }
  0x3d   :  { %v297_v13 = vand.u32 4294901760, %v1692_v42  ;;  %v264_v34 = vand.u32 4294901760, %v263_v45  ;;  %v1724_v37 = vsub.f32 %v1508_v0, %v1926_v22  ;;  %v1121_v43 = vpack.c.bf16 %v269_v24, %v262_v20 }
  0x3e   :  { %1002 = vmatpush1.bf16.msra.mxu1 %v1001_v33  ;;  %1110 = vmatpush1.bf16.msra.mxu0 %v1109_v3  ;;  %v270_v3 = vsub.f32 %v1658_v50, %v269_v24  ;;  %v1708_v57 = vsub.f32 %v1465_v53, %v1924_v15  ;;  %v1010_v33 = vpack.c.bf16 %v257_v26, %v250_v19  ;;  %v290_v10 = vand.u32 4294901760, %v1687_v21 }
  0x3f   :  { %1003 = vmatprep.subr.bf16.mxu1 %v1914_v2  ;;  %1111 = vmatprep.subr.bf16.mxu0 %v1914_v2  ;;  %v284_v49 = vsub.f32 %v1674_v25, %v283_v47  ;;  %v1925_v53 = vand.u32 4294901760, %v1503_v63  ;;  %v304_v40 = vand.u32 4294901760, %v1703_v29  ;;  %v1927_v0 = vand.u32 4294901760, %v1538_v6 }
  0x40   :  { %v271_v16 = vand.u32 4294901760, %v270_v3  ;;  %v291_v56 = vsub.f32 %v1687_v21, %v290_v10  ;;  %v1928_v24 = vand.u32 4294901760, %v1543_v8  ;;  %v1124_v15 = vpack.c.bf16 %v283_v47, %v276_v31 }
  0x41   :  { %v1719_v62 = vsub.f32 %v1503_v63, %v1925_v53  ;;  %v311_v63 = vand.u32 4294901760, %v1708_v57  ;;  %v1735_v20 = vsub.f32 %v1538_v6, %v1927_v0  ;;  %v305_v45 = vsub.f32 %v1703_v29, %v304_v40 }
  0x42   :  { %1005 = vmatpush1.bf16.msra.mxu1 %v1004_v46  ;;  %1113 = vmatpush1.bf16.msra.mxu0 %v1112_v36  ;;  %v277_v36 = vsub.f32 %v1669_v38, %v276_v31  ;;  %v298_v46 = vsub.f32 %v1692_v42, %v297_v13  ;;  %v1013_v41 = vpack.c.bf16 %v271_v16, %v264_v34  ;;  %v292_v26 = vand.u32 4294901760, %v291_v56 }
  0x43   :  { %1006 = vmatprep.subr.bf16.mxu1 %v1914_v2  ;;  %1114 = vmatprep.subr.bf16.mxu0 %v1914_v2  ;;  %v1740_v19 = vsub.f32 %v1543_v8, %v1928_v24  ;;  %v318_v3 = vand.u32 4294901760, %v1719_v62  ;;  %v325_v6 = vand.u32 4294901760, %v1724_v37  ;;  %v306_v34 = vand.u32 4294901760, %v305_v45 }
  0x44   :  { %v278_v52 = vand.u32 4294901760, %v277_v36  ;;  %v332_v31 = vand.u32 4294901760, %v1735_v20  ;;  %v1130_v53 = vpack.c.bf16 %v311_v63, %v304_v40  ;;  %v1031_v0 = vpack.c.bf16 %v1488_v61, %v1483_v60 }
  0x45   :  { %v319_v16 = vsub.f32 %v1719_v62, %v318_v3  ;;  %v339_v47 = vand.u32 4294901760, %v1740_v19  ;;  %v1034_v24 = vpack.c.bf16 %v1520_v5, %v1513_v1  ;;  %v1040_v60 = vpack.c.bf16 %v1592_v7, %v1585_v58  ;;  %v1932_v1 = vld [vmem:[#allocation9_spill] sm:$0xff]  ;;  %v1935_v58 = vld [vmem:[#allocation14_spill] sm:$0xff] }
  0x46   :  { %1008 = vmatpush1.bf16.msra.mxu1 %v1007_v27  ;;  %1116 = vmatpush1.bf16.msra.mxu0 %v1115_v30  ;;  %v285_v30 = vand.u32 4294901760, %v284_v49  ;;  %v299_v27 = vand.u32 4294901760, %v298_v46  ;;  %v326_v49 = vsub.f32 %v1724_v37, %v325_v6  ;;  %v1052_v61 = vpack.c.bf16 %v1674_v25, %v1669_v38  ;;  %v1939_v38 = vld [vmem:[#allocation15_spill] sm:$0xff] }
  0x47   :  { %1009 = vmatprep.subr.bf16.mxu1 %v1914_v2  ;;  %1117 = vmatprep.subr.bf16.mxu0 %v1914_v2  ;;  %v320_v22 = vand.u32 4294901760, %v319_v16  ;;  %v340_v56 = vsub.f32 %v1740_v19, %v339_v47  ;;  %v1055_v5 = vpack.c.bf16 %v1692_v42, %v1687_v21  ;;  %v1058_v7 = vpack.c.bf16 %v1708_v57, %v1703_v29 }
  0x48   :  { %v1016_v48 = vpack.c.bf16 %v285_v30, %v278_v52  ;;  %v1019_v8 = vpack.c.bf16 %v299_v27, %v292_v26  ;;  %v899_v16 = vlaneseq }
  0x49   :  { %v341_v30 = vand.u32 4294901760, %v340_v56 }
  0x4a   :  { %1011 = vmatpush1.bf16.msra.mxu1 %v1010_v33  ;;  %1119 = vmatpush1.bf16.msra.mxu0 %v1118_v9  ;;  %v312_v33 = vsub.f32 %v1708_v57, %v311_v63  ;;  %v1127_v9 = vpack.c.bf16 %v297_v13, %v290_v10  ;;  %v327_v13 = vand.u32 4294901760, %v326_v49  ;;  %v1136_v63 = vpack.c.bf16 %v339_v47, %v332_v31 }
  0x4b   :  { %1012 = vmatprep.subr.bf16.mxu1 %v1914_v2  ;;  %1120 = vmatprep.subr.bf16.mxu0 %v1914_v2  ;;  %v900_v47 = vshrl.u32 %v899_v16, 7 }
  0x4c   :  { %v313_v36 = vand.u32 4294901760, %v312_v33  ;;  %v1025_v46 = vpack.c.bf16 %v327_v13, %v320_v22 }
  0x4d   :  { %v901_v22 = vsub.s32 0, %v900_v47  ;;  %v907_v13 = vsub.s32 1, %v900_v47  ;;  %v913_v56 = vsub.s32 2, %v900_v47 }
  0x4e   :  { %1014 = vmatpush1.bf16.msra.mxu1 %v1013_v41  ;;  %1122 = vmatpush1.bf16.msra.mxu0 %v1121_v43  ;;  %v1022_v10 = vpack.c.bf16 %v313_v36, %v306_v34  ;;  %v333_v43 = vsub.f32 %v1735_v20, %v332_v31  ;;  %v1133_v41 = vpack.c.bf16 %v325_v6, %v318_v3 }
  0x4f   :  { %1015 = vmatprep.subr.bf16.mxu1 %v1914_v2  ;;  %1123 = vmatprep.subr.bf16.mxu0 %v1914_v2 }
  0x50   :  { %v334_v52 = vand.u32 4294901760, %v333_v43 }
  0x52   :  { %1017 = vmatpush1.bf16.msra.mxu1 %v1016_v48  ;;  %1125 = vmatpush1.bf16.msra.mxu0 %v1124_v15  ;;  %v1028_v40 = vpack.c.bf16 %v341_v30, %v334_v52 }
  0x53   :  { %1018 = vmatprep.subr.bf16.mxu1 %v1914_v2  ;;  %1126 = vmatprep.subr.bf16.mxu0 %v1914_v2 }
  0x56   :  { %1020 = vmatpush1.bf16.msra.mxu1 %v1019_v8  ;;  %1128 = vmatpush1.bf16.msra.mxu0 %v1127_v9 }
  0x57   :  { %1021 = vmatprep.subr.bf16.mxu1 %v1914_v2  ;;  %1129 = vmatprep.subr.bf16.mxu0 %v1914_v2 }
  0x5a   :  { %1023 = vmatpush1.bf16.msra.mxu1 %v1022_v10  ;;  %1131 = vmatpush1.bf16.msra.mxu0 %v1130_v53  ;;  %v896_v10 = vld [vmem:[%s1871_s3] sm:$0x7]  ;;  %s1229_s3 = smov [#allocation3]  }
  0x5b   :  { %1024 = vmatprep.subr.bf16.mxu1 %v1914_v2  ;;  %1132 = vmatprep.subr.bf16.mxu0 %v1914_v2  ;;  %v902_v43 = vrot.slane %v896_v10, %v901_v22  ;;  %v908_v52 = vrot.slane %v896_v10, %v907_v13  ;;  %s945_s24 = sshll.u32 %s1229_s3, 4  ;;  %s946_s24 = int_to_ptr.vmem [resolvable:$true] %s945_s24 }
  0x5c   :  { %s1204_s25 = scalar_lea.vmem %s946_s24, 256  ;;  %p1209_p1 = scmp.lt.s32.totalorder %s946_s24, %s946_s24 }
  0x5d   :  { %p1205_p0 = scmp.ne.s32.totalorder %s946_s24, %s1204_s25  ;;  %p1210_p2 = scmp.lt.s32.totalorder %s1204_s25, %s1204_s25 }
  0x5e   :  { %1026 = vmatpush1.bf16.msra.mxu1 %v1025_v46  ;;  %1134 = vmatpush1.bf16.msra.mxu0 %v1133_v41 }
  0x5f   :  { %1027 = vmatprep.subr.bf16.mxu1 %v1914_v2  ;;  %1135 = vmatprep.subr.bf16.mxu0 %v1914_v2  ;;  %p1211_p3 = por %p1210_p2, %p1209_p1 }
  0x61   :  { %p1212_p4 = pnand %p1211_p3, %p1205_p0 }
  0x62   :  { %1029 = vmatpush1.bf16.msra.mxu1 %v1028_v40  ;;  %1137 = vmatpush1.bf16.msra.mxu0 %v1136_v63  ;;  %v914_v40 = vrot.slane %v896_v10, %v913_v56 }
  0x63   :  { %1030 = vmatprep.subr.bf16.mxu1 %v1914_v2  ;;  %1138 = vmatprep.subr.bf16.mxu0 %v1914_v2 }
  0x65   :  { %362 = vmatmul.mubr.f32.vlgmr.msra.gmra.mrb[0].mxu1 %v1478_v59  ;;  %755 = vmatmul.mubr.f32.vlgmr.msra.gmra.mrb[0].mxu0 %v1478_v59 }
  0x66   :  { %1032 = vmatpush1.bf16.msra.mxu1 %v1031_v0  ;;  %1140 = vmatpush1.bf16.msra.mxu0 %v1302_v11  ;;  %v1037_v11 = vpack.c.bf16 %v1560_v55, %v1555_v54  ;;  %v1934_v54 = vld [vmem:[#allocation11_spill] sm:$0xff]  ;;  %v1061_v55 = vpack.c.bf16 %v1724_v37, %v1719_v62 }
  0x67   :  { %1033 = vmatprep.subr.bf16.mxu1 %v1914_v2  ;;  %1141 = vmatprep.subr.bf16.mxu0 %v1914_v2 }
  0x68   :  { %367 = vmatprep.mubr.f32.mxu1 %v1515_v4  ;;  %760 = vmatprep.mubr.f32.mxu0 %v1515_v4 }
  0x69   :  { %369 = vmatmul.mubr.f32.gmra.mrb[2].mxu1 %v1580_v14  ;;  %762 = vmatmul.mubr.f32.gmra.mrb[2].mxu0 %v1580_v14 }
  0x6a   :  { %1035 = vmatpush1.bf16.msra.mxu1 %v1034_v24  ;;  %1143 = vmatpush1.bf16.msra.mxu0 %v1310_v12  ;;  %v1043_v12 = vpack.c.bf16 %v1622_v28, %v1615_v51  ;;  %v1931_v51 = vld [vmem:[#allocation8_spill] sm:$0xff]  ;;  %v1933_v28 = vld [vmem:[#allocation10_spill] sm:$0xff] }
  0x6b   :  { %1036 = vmatprep.subr.bf16.mxu1 %v1914_v2  ;;  %1144 = vmatprep.subr.bf16.mxu0 %v1914_v2 }
  0x6c   :  { %488 = vmatprep.mubr.f32.mxu1 %v1399_v35  ;;  %856 = vmatprep.mubr.f32.mxu0 %v1384_v32  ;;  %v1929_v32 = vld [vmem:[#allocation6_spill] sm:$0xff]  ;;  %v1930_v35 = vld [vmem:[#allocation7_spill] sm:$0xff] }
  0x6e   :  { %1038 = vmatpush1.bf16.msra.mxu1 %v1037_v11  ;;  %1146 = vmatpush1.bf16.msra.mxu0 %v1332_v17  ;;  %v1046_v17 = vpack.c.bf16 %v1642_v18, %v1637_v39  ;;  %v1064_v39 = vpack.c.bf16 %v1740_v19, %v1735_v20  ;;  %v1936_v18 = vld [vmem:[#allocation16_spill] sm:$0xff] }
  0x6f   :  { %1039 = vmatprep.subr.bf16.mxu1 %v1914_v2  ;;  %1147 = vmatprep.subr.bf16.mxu0 %v1914_v2 }
  0x72   :  { %1041 = vmatpush1.bf16.msra.mxu1 %v1040_v60  ;;  %1149 = vmatpush1.bf16.msra.mxu0 %v1357_v23  ;;  %v1049_v23 = vpack.c.bf16 %v1658_v50, %v1653_v44  ;;  %v1937_v44 = vld [vmem:[#allocation12_spill] sm:$0xff]  ;;  %v1938_v50 = vld [vmem:[#allocation13_spill] sm:$0xff] }
  0x73   :  { %1042 = vmatprep.subr.bf16.mxu1 %v1914_v2  ;;  %1150 = vmatprep.subr.bf16.mxu0 %v1914_v2 }
  0x76   :  { %1044 = vmatpush1.bf16.msra.mxu1 %v1043_v12  ;;  %1152 = vmatpush1.bf16.msra.mxu0 %v1929_v32 }
  0x77   :  { %1045 = vmatprep.subr.bf16.mxu1 %v1914_v2  ;;  %1153 = vmatprep.subr.bf16.mxu0 %v1914_v2 }
  0x7a   :  { %1047 = vmatpush1.bf16.msra.mxu1 %v1046_v17  ;;  %1155 = vmatpush1.bf16.msra.mxu0 %v1930_v35 }
  0x7b   :  { %1048 = vmatprep.subr.bf16.mxu1 %v1914_v2  ;;  %1156 = vmatprep.subr.bf16.mxu0 %v1914_v2 }
  0x7e   :  { %1050 = vmatpush1.bf16.msra.mxu1 %v1049_v23  ;;  %1158 = vmatpush1.bf16.msra.mxu0 %v1931_v51 }
  0x7f   :  { %1051 = vmatprep.subr.bf16.mxu1 %v1914_v2  ;;  %1159 = vmatprep.subr.bf16.mxu0 %v1914_v2 }
  0x82   :  { %1053 = vmatpush1.bf16.msra.mxu1 %v1052_v61  ;;  %1161 = vmatpush1.bf16.msra.mxu0 %v1932_v1 }
  0x83   :  { %1054 = vmatprep.subr.bf16.mxu1 %v1914_v2  ;;  %1162 = vmatprep.subr.bf16.mxu0 %v1914_v2 }
  0x86   :  { %1056 = vmatpush1.bf16.msra.mxu1 %v1055_v5  ;;  %1164 = vmatpush1.bf16.msra.mxu0 %v1933_v28 }
  0x87   :  { %1057 = vmatprep.subr.bf16.mxu1 %v1914_v2  ;;  %1165 = vmatprep.subr.bf16.mxu0 %v1914_v2 }
  0x8a   :  { %1059 = vmatpush1.bf16.msra.mxu1 %v1058_v7  ;;  %1167 = vmatpush1.bf16.msra.mxu0 %v1934_v54 }
  0x8b   :  { %1060 = vmatprep.subr.bf16.mxu1 %v1914_v2  ;;  %1168 = vmatprep.subr.bf16.mxu0 %v1914_v2 }
  0x8e   :  { %1062 = vmatpush1.bf16.msra.mxu1 %v1061_v55  ;;  %1170 = vmatpush1.bf16.msra.mxu0 %v1935_v58 }
  0x8f   :  { %1063 = vmatprep.subr.bf16.mxu1 %v1914_v2  ;;  %1171 = vmatprep.subr.bf16.mxu0 %v1914_v2 }
  0x92   :  { %1065 = vmatpush1.bf16.msra.mxu1 %v1064_v39  ;;  %1173 = vmatpush1.bf16.msra.mxu0 %v1936_v18 }
  0x95   :  { %491 = vmatmul.mubr.f32.vlgmr.msra.gmra.mrb[0].mxu1 %v1937_v44  ;;  %858 = vmatmul.mubr.f32.vlgmr.msra.gmra.mrb[0].mxu0 %v1478_v59 }
  0x96   :  { %497 = vmatprep.mubr.f32.mxu1 %v1938_v50  ;;  %863 = vmatprep.mubr.f32.mxu0 %v1515_v4 }
  0x99   :  { %500 = vmatmul.mubr.f32.gmra.mrb[2].mxu1 %v1939_v38  ;;  %865 = vmatmul.mubr.f32.gmra.mrb[2].mxu0 %v1580_v14 }
 0x168   :  { %v492_v25 = vpop.f32.mrb[0].mxu1  ;;  %v859_v21 = vpop.f32.mrb[0].mxu0 }
 0x169   :  { %v1174_v42 = vadd.f32 %v859_v21, %v492_v25  ;;  %v494_v2 = vpop.f32.mrb[1].mxu1  ;;  %v861_v29 = vpop.f32.mrb[1].mxu0 }
 0x16b   :  { %v871_v57 = vsel %vm870_vm1, %v1174_v42, 0.0 }
 0x16c   :  { %v866_v62 = vpop.f32.mrb[2].mxu0  ;;  %872 = vadd.xlane.f32.xlu0 %v871_v57  ;;  %v501_v37 = vpop.f32.mrb[2].mxu1 }
 0x16d   :  { %v1175_v59 = vadd.f32 %v866_v62, %v501_v37  ;;  %v503_v20 = vpop.f32.mrb[3].mxu1  ;;  %v868_v19 = vpop.f32.mrb[3].mxu0 }
 0x16f   :  { %v874_v4 = vsel %vm870_vm1, %v1175_v59, 0.0 }
 0x170   :  { %875 = vadd.xlane.f32.xlu0 %v874_v4 }
 0x1f9   :  { %v873_v26 = vpop.xlane.xlu0 %872 }
 0x1fa   :  { %v878_v27 = vmul.f32 0.03125, %v873_v26 }
 0x1fc   :  { %v880_v14 = vsub.f32 %v1174_v42, %v878_v27 }
 0x1fd   :  { %v876_v45 = vpop.xlane.xlu0 %875 }
 0x1fe   :  { %v879_v3 = vmul.f32 0.03125, %v876_v45  ;;  %v882_v48 = vmul.f32 %v880_v14, %v880_v14 }
 0x200   :  { %v881_v15 = vsub.f32 %v1175_v59, %v879_v3  ;;  %v884_v33 = vsel %vm870_vm1, %v882_v48, 0.0 }
 0x201   :  { %885 = vadd.xlane.f32.xlu1 %v884_v33 }
 0x202   :  { %v883_v6 = vmul.f32 %v881_v15, %v881_v15 }
 0x204   :  { %v887_v8 = vsel %vm870_vm1, %v883_v6, 0.0 }
 0x205   :  { %888 = vadd.xlane.f32.xlu1 %v887_v8 }
 0x28e   :  { %v886_v9 = vpop.xlane.xlu1 %885 }
 0x28f   :  { %v890_v34 = vmul.f32 0.03125, %v886_v9 }
 0x291   :  { %v892_v36 = vadd.f32 1e-05, %v890_v34 }
 0x292   :  { %v889_v49 = vpop.xlane.xlu1 %888 }
 0x293   :  { %1196 = vrsqrt.f32 %v892_v36  ;;  %v891_v31 = vmul.f32 0.03125, %v889_v49 }
 0x295   :  { %v893_v53 = vadd.f32 1e-05, %v891_v31 }
 0x297   :  { %1198 = vrsqrt.f32 %v893_v53 }
 0x29d   :  { %v1197_v46 = vpop.eup %1196 }
 0x29e   :  { %v897_v41 = vmul.f32 %v1197_v46, %v880_v14 }
 0x2a0   :  { %v903_v30 = vmul.f32 %v902_v43, %v897_v41 }
 0x2a1   :  { %v1199_v63 = vpop.eup %1198 }
 0x2a2   :  { %v909_v0 = vadd.f32 %v908_v52, %v903_v30  ;;  %v898_v24 = vmul.f32 %v1199_v63, %v881_v15 }
 0x2a4   :  { %v915_v11 = vmul.f32 %v914_v40, %v909_v0  ;;  %936 = vst.msk [vmem:[#allocation3] sm:$0xff] %vm870_vm1, %v909_v0  ;;  %v904_v60 = vmul.f32 %v902_v43, %v898_v24 }
 0x2a6   :  { %v917_v12 = vsel %vm870_vm1, %v915_v11, 0.0  ;;  %v910_v32 = vadd.f32 %v908_v52, %v904_v60 }
 0x2a7   :  { %918 = vadd.xlane.f32.xlu0 %v917_v12 }
 0x2a8   :  { %v916_v17 = vmul.f32 %v914_v40, %v910_v32  ;;  %937 = vst.msk [vmem:[#allocation3 + $0x8] sm:$0xff] %vm870_vm1, %v910_v32 }
 0x2aa   :  { %v920_v35 = vsel %vm870_vm1, %v916_v17, 0.0 }
 0x2ab   :  { %921 = vadd.xlane.f32.xlu1 %v920_v35 }
 0x2ac   :  { %1215 = shalt.err (!%p1212_p4)
}
 0x2ad   :  { %s1216_s28 = scalar_lea.hbm %s1873_s5, 256 }
 0x2ae   :  { %p1217_p5 = scmp.ne.s32.totalorder %s1873_s5, %s1216_s28  ;;  %p1220_p6 = scmp.lt.u32.totalorder %s1216_s28, %s1873_s5 }
 0x2b0   :  { %p1222_p7 = pnand %p1220_p6, %p1217_p5 }
 0x2b2   :  { %1225 = shalt.err (!%p1222_p7)
}
 0x2b3   :  { %s1230_s8 = smov 128   ;;  %s1231_s9 = smov 8   ;;  %v924_v23 = vstv %s1868_s0  ;;  %vm933_vm2 = vcmask 7168  }
 0x2b4   :  { %951 = dma.vmem_to_hbm [thread:$0]  %s946_s24, 256, %s1873_s5, [#allocation4], %s1230_s8, %s1230_s8, %s1231_s9  }
 0x334   :  { %v919_v51 = vpop.xlane.xlu0 %918 }
 0x335   :  { %v925_v61 = vadd.f32 %v924_v23, %v919_v51 }
 0x337   :  { %1200 = vtanh.f32 %v925_v61 }
 0x338   :  { %v922_v1 = vpop.xlane.xlu1 %921 }
 0x339   :  { %v926_v5 = vadd.f32 %v924_v23, %v922_v1 }
 0x33b   :  { %1202 = vtanh.f32 %v926_v5 }
 0x341   :  { %v1201_v28 = vpop.eup %1200 }
 0x342   :  { %v929_v7 = vadd.f32 1.0, %v1201_v28 }
 0x344   :  { %v931_v54 = vmul.f32 0.5, %v929_v7 }
 0x345   :  { %v1203_v55 = vpop.eup %1202 }
 0x346   :  { %934 = vst.msk [vmem:[%s1872_s4] sm:$0xff] %vm933_vm2, %v931_v54  ;;  %v930_v58 = vadd.f32 1.0, %v1203_v55 }
 0x348   :  { %v932_v39 = vmul.f32 0.5, %v930_v58 }
 0x34a   :  { %935 = vst.msk [vmem:[%s1872_s4 + $0x8] sm:$0xff] %vm933_vm2, %v932_v39 }
 0x34b   :  { %1226 = dma.done.wait [#allocation4], 256  }
 0x34c   :  { %1227 = vsyncadd [#allocation4], 4294967040 }
 0x34d   :  { %957 = vsyncpa [#allocation4], 1 }

</bundles_post_ra>
